<compile_context>
chip_gen: v7x
topology: tpu7x:2x2x1
jax: 0.10.0
libtpu: 0.0.40
codegen_flags: <defaults>
</compile_context>

<pallas_src>
from functools import partial

import jax
import jax.numpy as jnp
from jax.experimental import pallas as pl
from jax.experimental.pallas import tpu as pltpu


def _pair(v):
    return (v, v) if isinstance(v, int) else tuple(v)


def _ghost_conv1_kernel(x_ref, w_ref, o_ref, slab_ref, *,
                        kh, kw, dh, dw, W, c_in, c_out,
                        h_out, w_out, acc_w, t_pad):
    """One batch element per grid step (stride == 1 path).

    x_ref:    (c_in, H*W)              bf16  VMEM (flattened NCHW image)
    w_ref:    (c_out, t_pad*c_in)      bf16  VMEM (prepacked, K padded, resident)
    o_ref:    (2*c_out, h_out*w_out)   f32   VMEM (flattened NCHW output, both halves)
    slab_ref: (t_pad, c_in, acc_w)     bf16  VMEM scratch (im2col slab, tap-major)
    """
    x = x_ref[...]                                   # (c_in, H*W)

    # --- im2col: one contiguous flat-shifted window per kernel tap. ------------------
    # acc column m = p*W + q  (output row p, col q, stride 1); tap (i, j) contributes
    # x[:, m + i*dh*W + j*dw], so each tap is a single contiguous slice of width acc_w.
    n_taps = kh * kw
    for i in range(kh):
        for j in range(kw):
            t = i * kw + j
            off = i * dh * W + j * dw
            slab_ref[t] = x[:, off:off + acc_w]      # (c_in, acc_w)
    if t_pad > n_taps:
        # Zero the K-padding rows (their weight columns are zero; must not be NaN).
        slab_ref[n_taps:] = jnp.zeros((t_pad - n_taps, c_in, acc_w), slab_ref.dtype)

    # --- single MXU matmul: (c_out, K_pad) @ (K_pad, acc_w) -> f32 accumulate. -------
    rhs = slab_ref[...].reshape(t_pad * c_in, acc_w)          # leading-dim merge only
    y = jnp.dot(w_ref[...], rhs, preferred_element_type=jnp.float32)
    y = y.astype(o_ref.dtype)                                 # (c_out, acc_w)

    # --- pack valid columns (drop the (kw-1)*dw wrap columns per row) and write both
    #     channel halves: GhostModule forward returns cat((y, y), dim=1). -------------
    for p in range(h_out):
        chunk = y[:, p * W:p * W + w_out]                     # (c_out, w_out)
        o_ref[0:c_out, p * w_out:(p + 1) * w_out] = chunk
        o_ref[c_out:2 * c_out, p * w_out:(p + 1) * w_out] = chunk


def ghost_conv1_pallas(x_nchw, w_mat_bf16, *, kernel_size, dilation):
    """conv1 (valid padding, stride 1, no bias) + channel duplication, NCHW in/out."""
    n, c_in, H, W = x_nchw.shape
    kh, kw = kernel_size
    dh, dw = dilation
    h_out = H - (kh - 1) * dh
    w_out = W - (kw - 1) * dw
    assert h_out >= 1 and w_out >= 1, "kernel/dilation too large for input"
    acc_w = (h_out - 1) * W + w_out                  # flat accumulator width (in-bounds)

    c_out, k_pad = w_mat_bf16.shape
    assert k_pad % c_in == 0
    t_pad = k_pad // c_in
    assert t_pad >= kh * kw

    # Free reshape (contiguous) + bf16 cast of activations for MXU / halved DMA.
    x_flat = x_nchw.reshape(n, c_in, H * W).astype(jnp.bfloat16)

    kernel = partial(_ghost_conv1_kernel, kh=kh, kw=kw, dh=dh, dw=dw, W=W,
                     c_in=c_in, c_out=c_out, h_out=h_out, w_out=w_out,
                     acc_w=acc_w, t_pad=t_pad)

    out_flat = pl.pallas_call(
        kernel,
        out_shape=jax.ShapeDtypeStruct((n, 2 * c_out, h_out * w_out), jnp.float32),
        grid=(n,),
        in_specs=[
            # Batch dim squeezed (None); whole flattened image per step.
            pl.BlockSpec((None, c_in, H * W), lambda b: (b, 0, 0)),
            # Prepacked weights: constant block index -> fetched once, resident.
            pl.BlockSpec((c_out, k_pad), lambda b: (0, 0)),
        ],
        out_specs=pl.BlockSpec((None, 2 * c_out, h_out * w_out), lambda b: (b, 0, 0)),
        scratch_shapes=[pltpu.VMEM((t_pad, c_in, acc_w), jnp.bfloat16)],
        compiler_params=pltpu.CompilerParams(
            dimension_semantics=("parallel",),          # megacore across batch
            vmem_limit_bytes=16 * 1024 * 1024,          # explicit budget (fits all chips)
        ),
    )(x_flat, w_mat_bf16)

    # Contiguous reshape back to NCHW (metadata only, no HBM round trip).
    return out_flat.reshape(n, 2 * c_out, h_out, w_out)


class GhostModule2dPallas:
    """JAX/Pallas equivalent of the reference GhostModule2d (default args:
    padding='valid', use_bias=False, identity/ghost transforms = Identity)."""

    def __init__(self, in_channels, filters, kernel_size, dw_kernel_size=None,
                 ratio=2, stride=1, dilation=1, *, key):
        assert filters % ratio == 0
        kernel_size = _pair(kernel_size)
        dw_kernel_size = _pair(dw_kernel_size) if dw_kernel_size is not None else kernel_size
        stride = _pair(stride)
        dilation = _pair(dilation)
        if stride != (1, 1):
            # TODO(synk): flat-shift im2col assumes stride == 1 (the module default);
            # a strided-gather path would be needed for stride > 1.
            raise NotImplementedError("GhostModule2dPallas currently supports stride=1 only")
        self.kernel_size = kernel_size
        self.dilation = dilation
        conv_filters = filters // ratio
        depth_conv_filters = filters - conv_filters
        self.conv_filters = conv_filters

        k1, k2 = jax.random.split(key)
        kh, kw = kernel_size
        fan_in1 = in_channels * kh * kw
        w1_oihw = jax.random.normal(
            k1, (conv_filters, in_channels, kh, kw), jnp.float32) / jnp.sqrt(fan_in1)
        self.w1_oihw = w1_oihw        # f32 copy (used by the reference check)

        # Prepack conv1 weights for the kernel: (O,C,KH,KW) -> (O, (i,j,c) flat),
        # pad contraction dim K = KH*KW*C to a multiple of 8, cast to bf16.
        k = kh * kw * in_channels
        t_pad = kh * kw
        while (t_pad * in_channels) % 8:
            t_pad += 1
        k_pad = t_pad * in_channels
        w_mat = jnp.transpose(w1_oihw, (0, 2, 3, 1)).reshape(conv_filters, k)
        w_mat = jnp.pad(w_mat, ((0, 0), (0, k_pad - k)))
        self.w_mat_bf16 = w_mat.astype(jnp.bfloat16)

        # conv2 (depthwise) parameters exist in the reference module, but its output is
        # overwritten by `ghost_x = self.ghost_transform(x)` in forward() and never used.
        # Kept for parameter fidelity; the (dead) compute is skipped.
        self.w2_dw = jax.random.normal(
            k2, (depth_conv_filters, 1) + dw_kernel_size, jnp.float32) / jnp.sqrt(
                dw_kernel_size[0] * dw_kernel_size[1])

    def __call__(self, x_nchw):
        return ghost_conv1_pallas(x_nchw, self.w_mat_bf16,
                                  kernel_size=self.kernel_size,
                                  dilation=self.dilation)


def _reference_forward(x_nchw, module):
    """Pure-JAX reference matching the PyTorch forward semantics, evaluated with the
    same bf16-rounded operands the kernel uses (exact products, f32 accumulation)."""
    x_bf = x_nchw.astype(jnp.bfloat16).astype(jnp.float32)
    w_bf = module.w1_oihw.astype(jnp.bfloat16).astype(jnp.float32)
    y = jax.lax.conv_general_dilated(
        x_bf, w_bf,
        window_strides=(1, 1),
        padding='VALID',
        rhs_dilation=module.dilation,
        dimension_numbers=('NCHW', 'OIHW', 'NCHW'),
        precision=jax.lax.Precision.HIGHEST)
    return jnp.concatenate([y, y], axis=1)


if __name__ == "__main__":
    key = jax.random.PRNGKey(0)
    k_x, k_w = jax.random.split(key)

    # Small, module-consistent shapes: N=2, C_in=4, H=W=16, filters=8, ratio=2, k=3.
    in_channels, filters, ksize = 4, 8, 3
    x = jax.random.normal(k_x, (2, in_channels, 16, 16), jnp.float32)

    mod = GhostModule2dPallas(in_channels, filters, ksize, ratio=2,
                              stride=1, dilation=1, key=k_w)

    out = jax.block_until_ready(mod(x))

    # Shape check: (N, filters, H-k+1, W-k+1) = (2, 8, 14, 14)
    assert out.shape == (2, filters, 14, 14), out.shape

    ref = jax.block_until_ready(_reference_forward(x, mod))
    max_err = float(jnp.max(jnp.abs(out - ref)))
    assert jnp.allclose(out, ref, atol=1e-3, rtol=1e-3), max_err

    print("KERNEL_OK")
</pallas_src>

<mosaic_0001>
module attributes {stable_mosaic.version = 11 : i64} {
  func.func @_ghost_conv1_kernel(%arg0: i32, %arg1: memref<1x4x256xbf16, #tpu.memory_space<vmem>>, %arg2: memref<4x40xbf16, #tpu.memory_space<vmem>>, %arg3: memref<1x8x196xf32, #tpu.memory_space<vmem>>, %arg4: memref<10x4x222xbf16, #tpu.memory_space<vmem>>) attributes {dimension_semantics = [#tpu.dimension_semantics<parallel>], iteration_bounds = array<i64: 2>, scalar_prefetch = 0 : i64, scratch_operands = 1 : i64, tpu.core_type = #tpu.core_type<tc>, window_params = [{transform_indices = @transform_0, window_bounds = array<i64: 1, 4, 256>}, {pipeline_mode = #tpu.pipeline_mode<synchronous>, transform_indices = @transform_1, window_bounds = array<i64: 4, 40>}, {transform_indices = @transform_2, window_bounds = array<i64: 1, 8, 196>}]} {
    %c0 = arith.constant 0 : index
    %c0_0 = arith.constant 0 : index
    %c0_1 = arith.constant 0 : index
    %0 = vector.load %arg1[%c0, %c0_0, %c0_1] : memref<1x4x256xbf16, #tpu.memory_space<vmem>>, vector<1x4x256xbf16>
    %1 = vector.shape_cast %0 : vector<1x4x256xbf16> to vector<4x256xbf16>
    %2 = vector.extract_strided_slice %1 {offsets = [0, 0], sizes = [4, 222], strides = [1, 1]} : vector<4x256xbf16> to vector<4x222xbf16>
    %c0_2 = arith.constant 0 : index
    %c0_3 = arith.constant 0 : index
    %c0_4 = arith.constant 0 : index
    %3 = vector.load %arg4[%c0_2, %c0_3, %c0_4] : memref<10x4x222xbf16, #tpu.memory_space<vmem>>, vector<1x4x222xbf16>
    %4 = vector.shape_cast %3 : vector<1x4x222xbf16> to vector<4x222xbf16>
    %5 = vector.shape_cast %2 : vector<4x222xbf16> to vector<1x4x222xbf16>
    tpu.vector_store %arg4[%c0_2, %c0_3, %c0_4], %5 {strides = array<i32>} : memref<10x4x222xbf16, #tpu.memory_space<vmem>>, vector<1x4x222xbf16>,
    %6 = vector.extract_strided_slice %1 {offsets = [0, 1], sizes = [4, 222], strides = [1, 1]} : vector<4x256xbf16> to vector<4x222xbf16>
    %c1 = arith.constant 1 : index
    %c0_5 = arith.constant 0 : index
    %c0_6 = arith.constant 0 : index
    %7 = vector.load %arg4[%c1, %c0_5, %c0_6] : memref<10x4x222xbf16, #tpu.memory_space<vmem>>, vector<1x4x222xbf16>
    %8 = vector.shape_cast %7 : vector<1x4x222xbf16> to vector<4x222xbf16>
    %9 = vector.shape_cast %6 : vector<4x222xbf16> to vector<1x4x222xbf16>
    tpu.vector_store %arg4[%c1, %c0_5, %c0_6], %9 {strides = array<i32>} : memref<10x4x222xbf16, #tpu.memory_space<vmem>>, vector<1x4x222xbf16>,
    %10 = vector.extract_strided_slice %1 {offsets = [0, 2], sizes = [4, 222], strides = [1, 1]} : vector<4x256xbf16> to vector<4x222xbf16>
    %c2 = arith.constant 2 : index
    %c0_7 = arith.constant 0 : index
    %c0_8 = arith.constant 0 : index
    %11 = vector.load %arg4[%c2, %c0_7, %c0_8] : memref<10x4x222xbf16, #tpu.memory_space<vmem>>, vector<1x4x222xbf16>
    %12 = vector.shape_cast %11 : vector<1x4x222xbf16> to vector<4x222xbf16>
    %13 = vector.shape_cast %10 : vector<4x222xbf16> to vector<1x4x222xbf16>
    tpu.vector_store %arg4[%c2, %c0_7, %c0_8], %13 {strides = array<i32>} : memref<10x4x222xbf16, #tpu.memory_space<vmem>>, vector<1x4x222xbf16>,
    %14 = vector.extract_strided_slice %1 {offsets = [0, 16], sizes = [4, 222], strides = [1, 1]} : vector<4x256xbf16> to vector<4x222xbf16>
    %c3 = arith.constant 3 : index
    %c0_9 = arith.constant 0 : index
    %c0_10 = arith.constant 0 : index
    %15 = vector.load %arg4[%c3, %c0_9, %c0_10] : memref<10x4x222xbf16, #tpu.memory_space<vmem>>, vector<1x4x222xbf16>
    %16 = vector.shape_cast %15 : vector<1x4x222xbf16> to vector<4x222xbf16>
    %17 = vector.shape_cast %14 : vector<4x222xbf16> to vector<1x4x222xbf16>
    tpu.vector_store %arg4[%c3, %c0_9, %c0_10], %17 {strides = array<i32>} : memref<10x4x222xbf16, #tpu.memory_space<vmem>>, vector<1x4x222xbf16>,
    %18 = vector.extract_strided_slice %1 {offsets = [0, 17], sizes = [4, 222], strides = [1, 1]} : vector<4x256xbf16> to vector<4x222xbf16>
    %c4 = arith.constant 4 : index
    %c0_11 = arith.constant 0 : index
    %c0_12 = arith.constant 0 : index
    %19 = vector.load %arg4[%c4, %c0_11, %c0_12] : memref<10x4x222xbf16, #tpu.memory_space<vmem>>, vector<1x4x222xbf16>
    %20 = vector.shape_cast %19 : vector<1x4x222xbf16> to vector<4x222xbf16>
    %21 = vector.shape_cast %18 : vector<4x222xbf16> to vector<1x4x222xbf16>
    tpu.vector_store %arg4[%c4, %c0_11, %c0_12], %21 {strides = array<i32>} : memref<10x4x222xbf16, #tpu.memory_space<vmem>>, vector<1x4x222xbf16>,
    %22 = vector.extract_strided_slice %1 {offsets = [0, 18], sizes = [4, 222], strides = [1, 1]} : vector<4x256xbf16> to vector<4x222xbf16>
    %c5 = arith.constant 5 : index
    %c0_13 = arith.constant 0 : index
    %c0_14 = arith.constant 0 : index
    %23 = vector.load %arg4[%c5, %c0_13, %c0_14] : memref<10x4x222xbf16, #tpu.memory_space<vmem>>, vector<1x4x222xbf16>
    %24 = vector.shape_cast %23 : vector<1x4x222xbf16> to vector<4x222xbf16>
    %25 = vector.shape_cast %22 : vector<4x222xbf16> to vector<1x4x222xbf16>
    tpu.vector_store %arg4[%c5, %c0_13, %c0_14], %25 {strides = array<i32>} : memref<10x4x222xbf16, #tpu.memory_space<vmem>>, vector<1x4x222xbf16>,
    %26 = vector.extract_strided_slice %1 {offsets = [0, 32], sizes = [4, 222], strides = [1, 1]} : vector<4x256xbf16> to vector<4x222xbf16>
    %c6 = arith.constant 6 : index
    %c0_15 = arith.constant 0 : index
    %c0_16 = arith.constant 0 : index
    %27 = vector.load %arg4[%c6, %c0_15, %c0_16] : memref<10x4x222xbf16, #tpu.memory_space<vmem>>, vector<1x4x222xbf16>
    %28 = vector.shape_cast %27 : vector<1x4x222xbf16> to vector<4x222xbf16>
    %29 = vector.shape_cast %26 : vector<4x222xbf16> to vector<1x4x222xbf16>
    tpu.vector_store %arg4[%c6, %c0_15, %c0_16], %29 {strides = array<i32>} : memref<10x4x222xbf16, #tpu.memory_space<vmem>>, vector<1x4x222xbf16>,
    %30 = vector.extract_strided_slice %1 {offsets = [0, 33], sizes = [4, 222], strides = [1, 1]} : vector<4x256xbf16> to vector<4x222xbf16>
    %c7 = arith.constant 7 : index
    %c0_17 = arith.constant 0 : index
    %c0_18 = arith.constant 0 : index
    %31 = vector.load %arg4[%c7, %c0_17, %c0_18] : memref<10x4x222xbf16, #tpu.memory_space<vmem>>, vector<1x4x222xbf16>
    %32 = vector.shape_cast %31 : vector<1x4x222xbf16> to vector<4x222xbf16>
    %33 = vector.shape_cast %30 : vector<4x222xbf16> to vector<1x4x222xbf16>
    tpu.vector_store %arg4[%c7, %c0_17, %c0_18], %33 {strides = array<i32>} : memref<10x4x222xbf16, #tpu.memory_space<vmem>>, vector<1x4x222xbf16>,
    %34 = vector.extract_strided_slice %1 {offsets = [0, 34], sizes = [4, 222], strides = [1, 1]} : vector<4x256xbf16> to vector<4x222xbf16>
    %c8 = arith.constant 8 : index
    %c0_19 = arith.constant 0 : index
    %c0_20 = arith.constant 0 : index
    %35 = vector.load %arg4[%c8, %c0_19, %c0_20] : memref<10x4x222xbf16, #tpu.memory_space<vmem>>, vector<1x4x222xbf16>
    %36 = vector.shape_cast %35 : vector<1x4x222xbf16> to vector<4x222xbf16>
    %37 = vector.shape_cast %34 : vector<4x222xbf16> to vector<1x4x222xbf16>
    tpu.vector_store %arg4[%c8, %c0_19, %c0_20], %37 {strides = array<i32>} : memref<10x4x222xbf16, #tpu.memory_space<vmem>>, vector<1x4x222xbf16>,
    %cst = arith.constant 0.000000e+00 : bf16
    %38 = vector.broadcast %cst : bf16 to vector<1x4x222xbf16>
    %c9 = arith.constant 9 : index
    %c0_21 = arith.constant 0 : index
    %c0_22 = arith.constant 0 : index
    %39 = vector.load %arg4[%c9, %c0_21, %c0_22] : memref<10x4x222xbf16, #tpu.memory_space<vmem>>, vector<1x4x222xbf16>
    tpu.vector_store %arg4[%c9, %c0_21, %c0_22], %38 {strides = array<i32>} : memref<10x4x222xbf16, #tpu.memory_space<vmem>>, vector<1x4x222xbf16>,
    %c0_23 = arith.constant 0 : index
    %c0_24 = arith.constant 0 : index
    %c0_25 = arith.constant 0 : index
    %40 = vector.load %arg4[%c0_23, %c0_24, %c0_25] : memref<10x4x222xbf16, #tpu.memory_space<vmem>>, vector<10x4x222xbf16>
    %41 = vector.shape_cast %40 : vector<10x4x222xbf16> to vector<40x222xbf16>
    %c0_26 = arith.constant 0 : index
    %c0_27 = arith.constant 0 : index
    %42 = vector.load %arg2[%c0_26, %c0_27] : memref<4x40xbf16, #tpu.memory_space<vmem>>, vector<4x40xbf16>
    %cst_28 = arith.constant dense<0.000000e+00> : vector<4x222xf32>
    %43 = tpu.matmul %42, %41, %cst_28 {dimension_numbers = #tpu.dot_dimension_numbers<[1], [0], [0], [1], [0, 0, 1, 1], [], []>} : vector<4x40xbf16>, vector<40x222xbf16>, vector<4x222xf32> -> vector<4x222xf32>
    %44 = vector.extract_strided_slice %43 {offsets = [0, 0], sizes = [4, 14], strides = [1, 1]} : vector<4x222xf32> to vector<4x14xf32>
    %c0_29 = arith.constant 0 : index
    %c0_30 = arith.constant 0 : index
    %c0_31 = arith.constant 0 : index
    %45 = vector.load %arg3[%c0_29, %c0_30, %c0_31] : memref<1x8x196xf32, #tpu.memory_space<vmem>>, vector<1x4x14xf32>
    %46 = vector.shape_cast %45 : vector<1x4x14xf32> to vector<4x14xf32>
    %47 = vector.shape_cast %44 : vector<4x14xf32> to vector<1x4x14xf32>
    tpu.vector_store %arg3[%c0_29, %c0_30, %c0_31], %47 {strides = array<i32>} : memref<1x8x196xf32, #tpu.memory_space<vmem>>, vector<1x4x14xf32>,
    %c0_32 = arith.constant 0 : index
    %c4_33 = arith.constant 4 : index
    %c0_34 = arith.constant 0 : index
    %48 = vector.load %arg3[%c0_32, %c4_33, %c0_34] : memref<1x8x196xf32, #tpu.memory_space<vmem>>, vector<1x4x14xf32>
    %49 = vector.shape_cast %48 : vector<1x4x14xf32> to vector<4x14xf32>
    %50 = vector.shape_cast %44 : vector<4x14xf32> to vector<1x4x14xf32>
    tpu.vector_store %arg3[%c0_32, %c4_33, %c0_34], %50 {strides = array<i32>} : memref<1x8x196xf32, #tpu.memory_space<vmem>>, vector<1x4x14xf32>,
    %51 = vector.extract_strided_slice %43 {offsets = [0, 16], sizes = [4, 14], strides = [1, 1]} : vector<4x222xf32> to vector<4x14xf32>
    %c0_35 = arith.constant 0 : index
    %c0_36 = arith.constant 0 : index
    %c14 = arith.constant 14 : index
    %52 = vector.load %arg3[%c0_35, %c0_36, %c14] : memref<1x8x196xf32, #tpu.memory_space<vmem>>, vector<1x4x14xf32>
    %53 = vector.shape_cast %52 : vector<1x4x14xf32> to vector<4x14xf32>
    %54 = vector.shape_cast %51 : vector<4x14xf32> to vector<1x4x14xf32>
    tpu.vector_store %arg3[%c0_35, %c0_36, %c14], %54 {strides = array<i32>} : memref<1x8x196xf32, #tpu.memory_space<vmem>>, vector<1x4x14xf32>,
    %c0_37 = arith.constant 0 : index
    %c4_38 = arith.constant 4 : index
    %c14_39 = arith.constant 14 : index
    %55 = vector.load %arg3[%c0_37, %c4_38, %c14_39] : memref<1x8x196xf32, #tpu.memory_space<vmem>>, vector<1x4x14xf32>
    %56 = vector.shape_cast %55 : vector<1x4x14xf32> to vector<4x14xf32>
    %57 = vector.shape_cast %51 : vector<4x14xf32> to vector<1x4x14xf32>
    tpu.vector_store %arg3[%c0_37, %c4_38, %c14_39], %57 {strides = array<i32>} : memref<1x8x196xf32, #tpu.memory_space<vmem>>, vector<1x4x14xf32>,
    %58 = vector.extract_strided_slice %43 {offsets = [0, 32], sizes = [4, 14], strides = [1, 1]} : vector<4x222xf32> to vector<4x14xf32>
    %c0_40 = arith.constant 0 : index
    %c0_41 = arith.constant 0 : index
    %c28 = arith.constant 28 : index
    %59 = vector.load %arg3[%c0_40, %c0_41, %c28] : memref<1x8x196xf32, #tpu.memory_space<vmem>>, vector<1x4x14xf32>
    %60 = vector.shape_cast %59 : vector<1x4x14xf32> to vector<4x14xf32>
    %61 = vector.shape_cast %58 : vector<4x14xf32> to vector<1x4x14xf32>
    tpu.vector_store %arg3[%c0_40, %c0_41, %c28], %61 {strides = array<i32>} : memref<1x8x196xf32, #tpu.memory_space<vmem>>, vector<1x4x14xf32>,
    %c0_42 = arith.constant 0 : index
    %c4_43 = arith.constant 4 : index
    %c28_44 = arith.constant 28 : index
    %62 = vector.load %arg3[%c0_42, %c4_43, %c28_44] : memref<1x8x196xf32, #tpu.memory_space<vmem>>, vector<1x4x14xf32>
    %63 = vector.shape_cast %62 : vector<1x4x14xf32> to vector<4x14xf32>
    %64 = vector.shape_cast %58 : vector<4x14xf32> to vector<1x4x14xf32>
    tpu.vector_store %arg3[%c0_42, %c4_43, %c28_44], %64 {strides = array<i32>} : memref<1x8x196xf32, #tpu.memory_space<vmem>>, vector<1x4x14xf32>,
    %65 = vector.extract_strided_slice %43 {offsets = [0, 48], sizes = [4, 14], strides = [1, 1]} : vector<4x222xf32> to vector<4x14xf32>
    %c0_45 = arith.constant 0 : index
    %c0_46 = arith.constant 0 : index
    %c42 = arith.constant 42 : index
    %66 = vector.load %arg3[%c0_45, %c0_46, %c42] : memref<1x8x196xf32, #tpu.memory_space<vmem>>, vector<1x4x14xf32>
    %67 = vector.shape_cast %66 : vector<1x4x14xf32> to vector<4x14xf32>
    %68 = vector.shape_cast %65 : vector<4x14xf32> to vector<1x4x14xf32>
    tpu.vector_store %arg3[%c0_45, %c0_46, %c42], %68 {strides = array<i32>} : memref<1x8x196xf32, #tpu.memory_space<vmem>>, vector<1x4x14xf32>,
    %c0_47 = arith.constant 0 : index
    %c4_48 = arith.constant 4 : index
    %c42_49 = arith.constant 42 : index
    %69 = vector.load %arg3[%c0_47, %c4_48, %c42_49] : memref<1x8x196xf32, #tpu.memory_space<vmem>>, vector<1x4x14xf32>
    %70 = vector.shape_cast %69 : vector<1x4x14xf32> to vector<4x14xf32>
    %71 = vector.shape_cast %65 : vector<4x14xf32> to vector<1x4x14xf32>
    tpu.vector_store %arg3[%c0_47, %c4_48, %c42_49], %71 {strides = array<i32>} : memref<1x8x196xf32, #tpu.memory_space<vmem>>, vector<1x4x14xf32>,
    %72 = vector.extract_strided_slice %43 {offsets = [0, 64], sizes = [4, 14], strides = [1, 1]} : vector<4x222xf32> to vector<4x14xf32>
    %c0_50 = arith.constant 0 : index
    %c0_51 = arith.constant 0 : index
    %c56 = arith.constant 56 : index
    %73 = vector.load %arg3[%c0_50, %c0_51, %c56] : memref<1x8x196xf32, #tpu.memory_space<vmem>>, vector<1x4x14xf32>
    %74 = vector.shape_cast %73 : vector<1x4x14xf32> to vector<4x14xf32>
    %75 = vector.shape_cast %72 : vector<4x14xf32> to vector<1x4x14xf32>
    tpu.vector_store %arg3[%c0_50, %c0_51, %c56], %75 {strides = array<i32>} : memref<1x8x196xf32, #tpu.memory_space<vmem>>, vector<1x4x14xf32>,
    %c0_52 = arith.constant 0 : index
    %c4_53 = arith.constant 4 : index
    %c56_54 = arith.constant 56 : index
    %76 = vector.load %arg3[%c0_52, %c4_53, %c56_54] : memref<1x8x196xf32, #tpu.memory_space<vmem>>, vector<1x4x14xf32>
    %77 = vector.shape_cast %76 : vector<1x4x14xf32> to vector<4x14xf32>
    %78 = vector.shape_cast %72 : vector<4x14xf32> to vector<1x4x14xf32>
    tpu.vector_store %arg3[%c0_52, %c4_53, %c56_54], %78 {strides = array<i32>} : memref<1x8x196xf32, #tpu.memory_space<vmem>>, vector<1x4x14xf32>,
    %79 = vector.extract_strided_slice %43 {offsets = [0, 80], sizes = [4, 14], strides = [1, 1]} : vector<4x222xf32> to vector<4x14xf32>
    %c0_55 = arith.constant 0 : index
    %c0_56 = arith.constant 0 : index
    %c70 = arith.constant 70 : index
    %80 = vector.load %arg3[%c0_55, %c0_56, %c70] : memref<1x8x196xf32, #tpu.memory_space<vmem>>, vector<1x4x14xf32>
    %81 = vector.shape_cast %80 : vector<1x4x14xf32> to vector<4x14xf32>
    %82 = vector.shape_cast %79 : vector<4x14xf32> to vector<1x4x14xf32>
    tpu.vector_store %arg3[%c0_55, %c0_56, %c70], %82 {strides = array<i32>} : memref<1x8x196xf32, #tpu.memory_space<vmem>>, vector<1x4x14xf32>,
    %c0_57 = arith.constant 0 : index
    %c4_58 = arith.constant 4 : index
    %c70_59 = arith.constant 70 : index
    %83 = vector.load %arg3[%c0_57, %c4_58, %c70_59] : memref<1x8x196xf32, #tpu.memory_space<vmem>>, vector<1x4x14xf32>
    %84 = vector.shape_cast %83 : vector<1x4x14xf32> to vector<4x14xf32>
    %85 = vector.shape_cast %79 : vector<4x14xf32> to vector<1x4x14xf32>
    tpu.vector_store %arg3[%c0_57, %c4_58, %c70_59], %85 {strides = array<i32>} : memref<1x8x196xf32, #tpu.memory_space<vmem>>, vector<1x4x14xf32>,
    %86 = vector.extract_strided_slice %43 {offsets = [0, 96], sizes = [4, 14], strides = [1, 1]} : vector<4x222xf32> to vector<4x14xf32>
    %c0_60 = arith.constant 0 : index
    %c0_61 = arith.constant 0 : index
    %c84 = arith.constant 84 : index
    %87 = vector.load %arg3[%c0_60, %c0_61, %c84] : memref<1x8x196xf32, #tpu.memory_space<vmem>>, vector<1x4x14xf32>
    %88 = vector.shape_cast %87 : vector<1x4x14xf32> to vector<4x14xf32>
    %89 = vector.shape_cast %86 : vector<4x14xf32> to vector<1x4x14xf32>
    tpu.vector_store %arg3[%c0_60, %c0_61, %c84], %89 {strides = array<i32>} : memref<1x8x196xf32, #tpu.memory_space<vmem>>, vector<1x4x14xf32>,
    %c0_62 = arith.constant 0 : index
    %c4_63 = arith.constant 4 : index
    %c84_64 = arith.constant 84 : index
    %90 = vector.load %arg3[%c0_62, %c4_63, %c84_64] : memref<1x8x196xf32, #tpu.memory_space<vmem>>, vector<1x4x14xf32>
    %91 = vector.shape_cast %90 : vector<1x4x14xf32> to vector<4x14xf32>
    %92 = vector.shape_cast %86 : vector<4x14xf32> to vector<1x4x14xf32>
    tpu.vector_store %arg3[%c0_62, %c4_63, %c84_64], %92 {strides = array<i32>} : memref<1x8x196xf32, #tpu.memory_space<vmem>>, vector<1x4x14xf32>,
    %93 = vector.extract_strided_slice %43 {offsets = [0, 112], sizes = [4, 14], strides = [1, 1]} : vector<4x222xf32> to vector<4x14xf32>
    %c0_65 = arith.constant 0 : index
    %c0_66 = arith.constant 0 : index
    %c98 = arith.constant 98 : index
    %94 = vector.load %arg3[%c0_65, %c0_66, %c98] : memref<1x8x196xf32, #tpu.memory_space<vmem>>, vector<1x4x14xf32>
    %95 = vector.shape_cast %94 : vector<1x4x14xf32> to vector<4x14xf32>
    %96 = vector.shape_cast %93 : vector<4x14xf32> to vector<1x4x14xf32>
    tpu.vector_store %arg3[%c0_65, %c0_66, %c98], %96 {strides = array<i32>} : memref<1x8x196xf32, #tpu.memory_space<vmem>>, vector<1x4x14xf32>,
    %c0_67 = arith.constant 0 : index
    %c4_68 = arith.constant 4 : index
    %c98_69 = arith.constant 98 : index
    %97 = vector.load %arg3[%c0_67, %c4_68, %c98_69] : memref<1x8x196xf32, #tpu.memory_space<vmem>>, vector<1x4x14xf32>
    %98 = vector.shape_cast %97 : vector<1x4x14xf32> to vector<4x14xf32>
    %99 = vector.shape_cast %93 : vector<4x14xf32> to vector<1x4x14xf32>
    tpu.vector_store %arg3[%c0_67, %c4_68, %c98_69], %99 {strides = array<i32>} : memref<1x8x196xf32, #tpu.memory_space<vmem>>, vector<1x4x14xf32>,
    %100 = vector.extract_strided_slice %43 {offsets = [0, 128], sizes = [4, 14], strides = [1, 1]} : vector<4x222xf32> to vector<4x14xf32>
    %c0_70 = arith.constant 0 : index
    %c0_71 = arith.constant 0 : index
    %c112 = arith.constant 112 : index
    %101 = vector.load %arg3[%c0_70, %c0_71, %c112] : memref<1x8x196xf32, #tpu.memory_space<vmem>>, vector<1x4x14xf32>
    %102 = vector.shape_cast %101 : vector<1x4x14xf32> to vector<4x14xf32>
    %103 = vector.shape_cast %100 : vector<4x14xf32> to vector<1x4x14xf32>
    tpu.vector_store %arg3[%c0_70, %c0_71, %c112], %103 {strides = array<i32>} : memref<1x8x196xf32, #tpu.memory_space<vmem>>, vector<1x4x14xf32>,
    %c0_72 = arith.constant 0 : index
    %c4_73 = arith.constant 4 : index
    %c112_74 = arith.constant 112 : index
    %104 = vector.load %arg3[%c0_72, %c4_73, %c112_74] : memref<1x8x196xf32, #tpu.memory_space<vmem>>, vector<1x4x14xf32>
    %105 = vector.shape_cast %104 : vector<1x4x14xf32> to vector<4x14xf32>
    %106 = vector.shape_cast %100 : vector<4x14xf32> to vector<1x4x14xf32>
    tpu.vector_store %arg3[%c0_72, %c4_73, %c112_74], %106 {strides = array<i32>} : memref<1x8x196xf32, #tpu.memory_space<vmem>>, vector<1x4x14xf32>,
    %107 = vector.extract_strided_slice %43 {offsets = [0, 144], sizes = [4, 14], strides = [1, 1]} : vector<4x222xf32> to vector<4x14xf32>
    %c0_75 = arith.constant 0 : index
    %c0_76 = arith.constant 0 : index
    %c126 = arith.constant 126 : index
    %108 = vector.load %arg3[%c0_75, %c0_76, %c126] : memref<1x8x196xf32, #tpu.memory_space<vmem>>, vector<1x4x14xf32>
    %109 = vector.shape_cast %108 : vector<1x4x14xf32> to vector<4x14xf32>
    %110 = vector.shape_cast %107 : vector<4x14xf32> to vector<1x4x14xf32>
    tpu.vector_store %arg3[%c0_75, %c0_76, %c126], %110 {strides = array<i32>} : memref<1x8x196xf32, #tpu.memory_space<vmem>>, vector<1x4x14xf32>,
    %c0_77 = arith.constant 0 : index
    %c4_78 = arith.constant 4 : index
    %c126_79 = arith.constant 126 : index
    %111 = vector.load %arg3[%c0_77, %c4_78, %c126_79] : memref<1x8x196xf32, #tpu.memory_space<vmem>>, vector<1x4x14xf32>
    %112 = vector.shape_cast %111 : vector<1x4x14xf32> to vector<4x14xf32>
    %113 = vector.shape_cast %107 : vector<4x14xf32> to vector<1x4x14xf32>
    tpu.vector_store %arg3[%c0_77, %c4_78, %c126_79], %113 {strides = array<i32>} : memref<1x8x196xf32, #tpu.memory_space<vmem>>, vector<1x4x14xf32>,
    %114 = vector.extract_strided_slice %43 {offsets = [0, 160], sizes = [4, 14], strides = [1, 1]} : vector<4x222xf32> to vector<4x14xf32>
    %c0_80 = arith.constant 0 : index
    %c0_81 = arith.constant 0 : index
    %c140 = arith.constant 140 : index
    %115 = vector.load %arg3[%c0_80, %c0_81, %c140] : memref<1x8x196xf32, #tpu.memory_space<vmem>>, vector<1x4x14xf32>
    %116 = vector.shape_cast %115 : vector<1x4x14xf32> to vector<4x14xf32>
    %117 = vector.shape_cast %114 : vector<4x14xf32> to vector<1x4x14xf32>
    tpu.vector_store %arg3[%c0_80, %c0_81, %c140], %117 {strides = array<i32>} : memref<1x8x196xf32, #tpu.memory_space<vmem>>, vector<1x4x14xf32>,
    %c0_82 = arith.constant 0 : index
    %c4_83 = arith.constant 4 : index
    %c140_84 = arith.constant 140 : index
    %118 = vector.load %arg3[%c0_82, %c4_83, %c140_84] : memref<1x8x196xf32, #tpu.memory_space<vmem>>, vector<1x4x14xf32>
    %119 = vector.shape_cast %118 : vector<1x4x14xf32> to vector<4x14xf32>
    %120 = vector.shape_cast %114 : vector<4x14xf32> to vector<1x4x14xf32>
    tpu.vector_store %arg3[%c0_82, %c4_83, %c140_84], %120 {strides = array<i32>} : memref<1x8x196xf32, #tpu.memory_space<vmem>>, vector<1x4x14xf32>,
    %121 = vector.extract_strided_slice %43 {offsets = [0, 176], sizes = [4, 14], strides = [1, 1]} : vector<4x222xf32> to vector<4x14xf32>
    %c0_85 = arith.constant 0 : index
    %c0_86 = arith.constant 0 : index
    %c154 = arith.constant 154 : index
    %122 = vector.load %arg3[%c0_85, %c0_86, %c154] : memref<1x8x196xf32, #tpu.memory_space<vmem>>, vector<1x4x14xf32>
    %123 = vector.shape_cast %122 : vector<1x4x14xf32> to vector<4x14xf32>
    %124 = vector.shape_cast %121 : vector<4x14xf32> to vector<1x4x14xf32>
    tpu.vector_store %arg3[%c0_85, %c0_86, %c154], %124 {strides = array<i32>} : memref<1x8x196xf32, #tpu.memory_space<vmem>>, vector<1x4x14xf32>,
    %c0_87 = arith.constant 0 : index
    %c4_88 = arith.constant 4 : index
    %c154_89 = arith.constant 154 : index
    %125 = vector.load %arg3[%c0_87, %c4_88, %c154_89] : memref<1x8x196xf32, #tpu.memory_space<vmem>>, vector<1x4x14xf32>
    %126 = vector.shape_cast %125 : vector<1x4x14xf32> to vector<4x14xf32>
    %127 = vector.shape_cast %121 : vector<4x14xf32> to vector<1x4x14xf32>
    tpu.vector_store %arg3[%c0_87, %c4_88, %c154_89], %127 {strides = array<i32>} : memref<1x8x196xf32, #tpu.memory_space<vmem>>, vector<1x4x14xf32>,
    %128 = vector.extract_strided_slice %43 {offsets = [0, 192], sizes = [4, 14], strides = [1, 1]} : vector<4x222xf32> to vector<4x14xf32>
    %c0_90 = arith.constant 0 : index
    %c0_91 = arith.constant 0 : index
    %c168 = arith.constant 168 : index
    %129 = vector.load %arg3[%c0_90, %c0_91, %c168] : memref<1x8x196xf32, #tpu.memory_space<vmem>>, vector<1x4x14xf32>
    %130 = vector.shape_cast %129 : vector<1x4x14xf32> to vector<4x14xf32>
    %131 = vector.shape_cast %128 : vector<4x14xf32> to vector<1x4x14xf32>
    tpu.vector_store %arg3[%c0_90, %c0_91, %c168], %131 {strides = array<i32>} : memref<1x8x196xf32, #tpu.memory_space<vmem>>, vector<1x4x14xf32>,
    %c0_92 = arith.constant 0 : index
    %c4_93 = arith.constant 4 : index
    %c168_94 = arith.constant 168 : index
    %132 = vector.load %arg3[%c0_92, %c4_93, %c168_94] : memref<1x8x196xf32, #tpu.memory_space<vmem>>, vector<1x4x14xf32>
    %133 = vector.shape_cast %132 : vector<1x4x14xf32> to vector<4x14xf32>
    %134 = vector.shape_cast %128 : vector<4x14xf32> to vector<1x4x14xf32>
    tpu.vector_store %arg3[%c0_92, %c4_93, %c168_94], %134 {strides = array<i32>} : memref<1x8x196xf32, #tpu.memory_space<vmem>>, vector<1x4x14xf32>,
    %135 = vector.extract_strided_slice %43 {offsets = [0, 208], sizes = [4, 14], strides = [1, 1]} : vector<4x222xf32> to vector<4x14xf32>
    %c0_95 = arith.constant 0 : index
    %c0_96 = arith.constant 0 : index
    %c182 = arith.constant 182 : index
    %136 = vector.load %arg3[%c0_95, %c0_96, %c182] : memref<1x8x196xf32, #tpu.memory_space<vmem>>, vector<1x4x14xf32>
    %137 = vector.shape_cast %136 : vector<1x4x14xf32> to vector<4x14xf32>
    %138 = vector.shape_cast %135 : vector<4x14xf32> to vector<1x4x14xf32>
    tpu.vector_store %arg3[%c0_95, %c0_96, %c182], %138 {strides = array<i32>} : memref<1x8x196xf32, #tpu.memory_space<vmem>>, vector<1x4x14xf32>,
    %c0_97 = arith.constant 0 : index
    %c4_98 = arith.constant 4 : index
    %c182_99 = arith.constant 182 : index
    %139 = vector.load %arg3[%c0_97, %c4_98, %c182_99] : memref<1x8x196xf32, #tpu.memory_space<vmem>>, vector<1x4x14xf32>
    %140 = vector.shape_cast %139 : vector<1x4x14xf32> to vector<4x14xf32>
    %141 = vector.shape_cast %135 : vector<4x14xf32> to vector<1x4x14xf32>
    tpu.vector_store %arg3[%c0_97, %c4_98, %c182_99], %141 {strides = array<i32>} : memref<1x8x196xf32, #tpu.memory_space<vmem>>, vector<1x4x14xf32>,
    return
  }
  func.func @transform_0(%arg0: i32) -> (i32, i32, i32) {
    %c0_i32 = arith.constant 0 : i32
    %c0_i32_0 = arith.constant 0 : i32
    %c0_i32_1 = arith.constant 0 : i32
    return %arg0, %c0_i32, %c0_i32_0 : i32, i32, i32
  }
  func.func @transform_1(%arg0: i32) -> (i32, i32) {
    %c0_i32 = arith.constant 0 : i32
    %c0_i32_0 = arith.constant 0 : i32
    %c0_i32_1 = arith.constant 0 : i32
    return %c0_i32, %c0_i32_0 : i32, i32
  }
  func.func @transform_2(%arg0: i32) -> (i32, i32, i32) {
    %c0_i32 = arith.constant 0 : i32
    %c0_i32_0 = arith.constant 0 : i32
    %c0_i32_1 = arith.constant 0 : i32
    return %arg0, %c0_i32, %c0_i32_0 : i32, i32, i32
  }
}

</mosaic_0001>

<bundles_post_ra>
// kernel: tpu_custom_call.1
= control target key start
LH: loop header
LB: loop body
LE: loop exit
PB: predicated region body
PF: predicated region fallthrough
CT: control target
= control target key end

     0   :  { %7 = vsyncpa [#allocation4], 0  ;;  %s1042_s0 = inlined_call_operand.hbm [shape: bf16[2,4,256], index: 0, kind: input, shape index: {}]   ;;  %s1043_s1 = inlined_call_operand.vmem [shape: bf16[4,40], index: 1, kind: input, shape index: {}]   ;;  %s1044_s2 = inlined_call_operand.hbm [shape: f32[2,8,196], index: 2, kind: output, shape index: {}]  }
   0x1   :  { %9 = vsyncpa [#allocation4 + $0x1], 0 }
   0x2   :  { %10 = vsyncpa [#allocation5], 0 }
   0x3   :  { %12 = vsyncpa [#allocation5 + $0x1], 0  ;;  %s811_s9 = smov 0   ;;  %s813_s10 = smov 0  }
   0x4   :  { %s815_s11 = smov 0   ;;  %s817_s12 = smov 0  }
   0x5 LB: > { %s832_s13 = sadd.s32 4294967295, %s773_s12   ;;  %s583_s14 = sadd.s32 4294967294, %s773_s12   ;;  %s773_s12 = sphi %s817_s12, %s1061_s12   ;;  %s769_s11 = sphi %s815_s11, %s1060_s11   ;;  %s765_s10 = sphi %s813_s10, %s1059_s10   ;;  %s761_s9 = sphi %s811_s9, %s1058_s9  }
   0x6   : > { %s836_s15 = sadd.s32 1, %s773_s12   ;;  %s25_s16 = sadd.s32 1, %s769_s11 }
   0x7   : > { %s22_s17 = ssub.s32 %s773_s12, %s836_s15  ;;  %p32_p0 = scmp.ne.s32.totalorder %s769_s11, %s765_s10 }
   0x8   : > { %p23_p1 = scmp.eq.s32.totalorder %s22_s17, 0  ;;  %p33_p2 = scmp.eq.s32.totalorder %s773_s12, 0 }
   0x9   : > { %p38_p3 = scmp.ne.s32.totalorder %s765_s10, %s761_s9  ;;  %p39_p4 = scmp.eq.s32.totalorder %s832_s13, 0 }
   0xa   : > { %s848_s18 = scalar_select %p23_p1, %s769_s11, %s25_s16  }
   0xb   : > { %p850_p5 = por %p33_p2, %p32_p0  ;;  %p854_p6 = por %p39_p4, %p38_p3 }
   0xc   : > { %p83_p7 = scmp.eq.s32.totalorder %s832_s13, 1  ;;  %p89_p8 = scmp.eq.s32.totalorder %s583_s14, 1 }
   0xd   : > { %p613_p10 = scmp.lt.s32.totalorder %s773_s12, 2  ;;  %s112_s23 = sand.u32 1, %s769_s11  }
   0xe   : > { %p861_p11 = por %p83_p7, %p32_p0  ;;  %p865_p12 = por %p89_p8, %p38_p3 }
   0xf   : > { %s599_s24 = sshll.u32 %s773_s12, 6  ;;  %s586_s25 = sshll.u32 %s112_s23, 2 }
  0x10   : > { %s1048_s21 = scalar_select %p861_p11, 1, 0 }
  0x11   : > { %s1049_s22 = scalar_select %p865_p12, 1, 0 }
  0x12   : > { %s874_s28 = scalar_lea.hbm %s1042_s0, %s599_s24  ;;  %s116_s29 = scalar_lea.vmem [#allocation3], %s586_s25 }
  0x13   : > { %s124_s30 = sshll.u32 %s116_s29, 4  ;;  %p878_p13 = pnand %p613_p10, %p850_p5  ;;  %s882_s30 = int_to_ptr.vmem [resolvable:$true] %s124_s30 }
  0x14   : > { %s113_s4 = scalar_lea.sflag [#allocation4], %s112_s23  ;;  %s677_s5 = scalar_lea.hbm %s874_s28, 64 }
  0x15   : > { %p678_p2 = scmp.ne.s32.totalorder %s874_s28, %s677_s5  ;;  %p679_p3 = pneg %p878_p13 }
  0x16   : > { %s682_s8 = scalar_lea.hbm %s1042_s0, 128  ;;  %p683_p5 = scmp.lt.u32.totalorder %s874_s28, %s1042_s0 }
  0x17   : > { %p680_p4 = pnand %p679_p3, %p678_p2  ;;  %p684_p8 = scmp.lt.u32.totalorder %s682_s8, %s677_s5 }
  0x18   : > { %p686_p9 = scmp.lt.u32.totalorder %s677_s5, %s874_s28 }
  0x19   : > { %p681_p7 = pneg %p680_p4  ;;  %p685_p10 = por %p684_p8, %p683_p5 }
  0x1b   : > { %p687_p0 = por %p686_p9, %p685_p10 }
  0x1d   : > { %p688_p1 = pnand %p687_p0, %p681_p7 }
  0x1f   : > { %691 = shalt.err (!%p688_p1)
}
  0x20   : > { %s692_s17 = scalar_lea.vmem %s882_s30, 64  ;;  %s775_s19 = smov [#allocation3]  }
  0x21   : > { %p693_p2 = scmp.ne.s32.totalorder %s882_s30, %s692_s17  ;;  %s697_s23 = sshll.u32 %s775_s19, 4  ;;  %s698_s23 = int_to_ptr.vmem [resolvable:$false] %s697_s23 }
  0x22   : > { %s699_s24 = scalar_lea.vmem %s698_s23, 128  ;;  %p700_p11 = scmp.lt.s32.totalorder %s882_s30, %s698_s23 }
  0x23   : > { %p695_p4 = pnand %p693_p2, %p679_p3  ;;  %p701_p5 = scmp.lt.s32.totalorder %s699_s24, %s692_s17 }
  0x25   : > { %p696_p12 = pneg %p695_p4  ;;  %p702_p8 = por %p701_p5, %p700_p11 }
  0x27   : > { %p703_p9 = pnand %p702_p8, %p696_p12 }
  0x29   : > { %706 = shalt.err (!%p703_p9)
}
  0x2a   : > { %608 = dma.hbm_to_vmem [thread:$0]  (!%p878_p13), %s874_s28, 64, %s882_s30, %s113_s4  }
  0x2b   : > { %p1051_p0 = scmp.lt.s32.totalorder %s773_s12, 3  ;;  %p1052_p1 = scmp.ge.s32.totalorder %s773_s12, 1 }
  0x2d   : > { %p130_p3 = pnand %p1052_p1, %p1051_p0 }
  0x2e   : > { %s916_s25 = sand.u32 (!%p130_p3), 1, %s765_s10  }
  0x2f   : > { %133 = sbr.rel (%p130_p3) target bundleno = 595 (0x253), region = 28  ;;  %s590_s26 = sshll.u32 (!%p130_p3), %s916_s25, 2 }
  0x30   : > { %s136_s27 = scalar_lea.sflag (!%p130_p3), [#allocation4], %s916_s25  ;;  %s139_s29 = scalar_lea.vmem (!%p130_p3), [#allocation3], %s590_s26 }
  0x36   : > { %752 = dma.done.wait (%p854_p6), %s136_s27, 64  }
  0x37   : > { %754 = vsyncadd (%p854_p6), %s136_s27, 4294967232  ;;  %vm162_vm0 = vcmask 1041408   ;;  %vm163_vm1 = vcmask 764930   ;;  %v161_v1 = vld [vmem:[%s139_s29] sm:$0xf]  ;;  %s776_s28 = smov 127  }
  0x38   : > { %vm924_vm2 = vmor %vm163_vm1, %vm162_vm0  ;;  %167 = vrot.lane.b32.xlu0 %v161_v1, %s776_s28  ;;  %s777_s30 = smov 112   ;;  %s778_s3 = smov 126   ;;  %v780_v2 = vmov 0   ;;  %vm170_vm3 = vcmask 1039360   ;;  %vm186_vm4 = vcmask 916480   ;;  %vm178_vm5 = vcmask 1031168  }
  0x39   : > { %183 = vrot.lane.b32.xlu1 %v161_v1, %s777_s30  ;;  %165 = vst.msk [vmem:[#allocation2] sm:$0xf] %vm924_vm2, %v161_v1  ;;  %s779_s20 = smov 111   ;;  %232 = vst.msk [vmem:[#allocation2 + $0x24] sm:$0xf] %vm924_vm2, %v780_v2  ;;  %346 = vmatprep.mubr.bf16.mxu0 %v780_v2  ;;  %s781_s4 = smov 110  }
  0x3a   : > { %s782_s5 = smov 96   ;;  %s783_s6 = smov 95   ;;  %vm194_vm6 = vcmask 908288   ;;  %vm202_vm7 = vcmask 900096   ;;  %vm210_vm8 = vcmask 785408   ;;  %vm218_vm9 = vcmask 777216  }
  0x3b   : > { %s784_s7 = smov 94   ;;  %vm226_vm10 = vcmask 769024   ;;  %vm307_vm11 = vcmask 1043456   ;;  %v243_v38 = vld [vmem:[%s1043_s1] sm:$0x3]  ;;  %vm303_vm12 = vcmask 326656  }
  0x3c   : > { %175 = vrot.lane.b32.xlu0 %v161_v1, %s778_s3  ;;  %s591_s16 = sshll.u32 %s916_s25, 4  ;;  %vm355_vm13 = vcmask 109568   ;;  %vm360_vm14 = vcmask 113668   ;;  %s785_s19 = smov 124   ;;  %vm365_vm15 = vcmask 224368   ;;  %vm370_vm0 = vcmask 228468  }
  0x3d   : > { %191 = vrot.lane.b32.xlu1 %v161_v1, %s779_s20  ;;  %s956_s17 = scalar_lea.vmem [#allocation6], %s591_s16  ;;  %s786_s23 = smov 122   ;;  %vm375_vm1 = vcmask 339168  }
  0x3e   : > { %s787_s24 = smov 120   ;;  %s788_s26 = smov 118  }
  0x3f   : > { %s789_s27 = smov 116   ;;  %s790_s29 = smov 114  }
  0x40   : > { %199 = vrot.lane.b32.xlu0 %v161_v1, %s781_s4  ;;  %s791_s28 = smov 108   ;;  %s793_s20 = smov 104  }
  0x41   : > { %207 = vrot.lane.b32.xlu1 %v161_v1, %s782_s5  ;;  %s794_s5 = smov 102   ;;  %s499_s14 = scalar_lea.sflag [#allocation5], %s916_s25 }
  0x42   : > { %p1055_p11 = scmp.ne.s32.totalorder %s1048_s21, 0 }
  0x44   : > { %215 = vrot.lane.b32.xlu0 %v161_v1, %s783_s6 }
  0x45   : > { %223 = vrot.lane.b32.xlu1 %v161_v1, %s784_s7 }
  0xaa   : > { %v168_v3 = vpop.permute.xlu0 %167 }
  0xab   : > { %v184_v4 = vpop.permute.xlu1 %183  ;;  %v169_v5 = vrot.slane %v168_v3, 2 }
  0xac   : > { %v185_v6 = vrot.slane %v184_v4, 2 }
  0xad   : > { %v171_v7 = vsel %vm170_vm3, %v168_v3, %v169_v5  ;;  %vm385_vm3 = vcmask 453968  }
  0xae   : > { %v187_v8 = vsel %vm186_vm4, %v184_v4, %v185_v6  ;;  %174 = vst.msk [vmem:[#allocation2 + $0x4] sm:$0xf] %vm924_vm2, %v171_v7  ;;  %v176_v9 = vpop.permute.xlu0 %175  ;;  %vm390_vm4 = vcmask 458068  }
  0xaf   : > { %190 = vst.msk [vmem:[#allocation2 + $0xc] sm:$0xf] %vm924_vm2, %v187_v8  ;;  %v192_v10 = vpop.permute.xlu1 %191  ;;  %v177_v11 = vrot.slane %v176_v9, 2 }
  0xb0   : > { %v193_v12 = vrot.slane %v192_v10, 2 }
  0xb1   : > { %v179_v13 = vsel %vm178_vm5, %v176_v9, %v177_v11  ;;  %vm395_vm5 = vcmask 568768  }
  0xb2   : > { %v195_v14 = vsel %vm194_vm6, %v192_v10, %v193_v12  ;;  %182 = vst.msk [vmem:[#allocation2 + $0x8] sm:$0xf] %vm924_vm2, %v179_v13  ;;  %v200_v15 = vpop.permute.xlu0 %199  ;;  %vm400_vm6 = vcmask 572868  }
  0xb3   : > { %198 = vst.msk [vmem:[#allocation2 + $0x10] sm:$0xf] %vm924_vm2, %v195_v14  ;;  %v208_v16 = vpop.permute.xlu1 %207  ;;  %v201_v17 = vrot.slane %v200_v15, 2 }
  0xb4   : > { %v209_v18 = vrot.slane %v208_v16, 2 }
  0xb5   : > { %v203_v19 = vsel %vm202_vm7, %v200_v15, %v201_v17  ;;  %v672_v25 = vld.sshfl [vmem:[#allocation2] sm:$0xff pattern:$0x76325410]  ;;  %vm405_vm7 = vcmask 683568  }
  0xb6   : > { %v211_v20 = vsel %vm210_vm8, %v208_v16, %v209_v18  ;;  %206 = vst.msk [vmem:[#allocation2 + $0x14] sm:$0xf] %vm924_vm2, %v203_v19  ;;  %v216_v21 = vpop.permute.xlu0 %215  ;;  %vm410_vm8 = vcmask 687668  }
  0xb7   : > { %214 = vst.msk [vmem:[#allocation2 + $0x18] sm:$0xf] %vm924_vm2, %v211_v20  ;;  %v224_v22 = vpop.permute.xlu1 %223  ;;  %v217_v23 = vrot.slane %v216_v21, 2 }
  0xb8   : > { %v225_v24 = vrot.slane %v224_v22, 2 }
  0xb9   : > { %v219_v26 = vsel %vm218_vm9, %v216_v21, %v217_v23  ;;  %v673_v28 = vld.sshfl [vmem:[#allocation2 + $0x8] sm:$0xff pattern:$0x76325410]  ;;  %vm415_vm9 = vcmask 798368  }
  0xba   : > { %v227_v27 = vsel %vm226_vm10, %v224_v22, %v225_v24  ;;  %222 = vst.msk [vmem:[#allocation2 + $0x1c] sm:$0xf] %vm924_vm2, %v219_v26  ;;  %v271_v29 = vcombine.high %v672_v25, %v673_v28  ;;  %v270_v30 = vcombine.low %v672_v25, %v673_v28  ;;  %vm420_vm10 = vcmask 802468  }
  0xbb   : > { %230 = vst.msk [vmem:[#allocation2 + $0x20] sm:$0xf] %vm924_vm2, %v227_v27  ;;  %vm380_vm2 = vcmask 343268  }
  0xbc   : > { %314 = vmatprep.subr.bf16.mxu0 %v271_v29 }
  0xbd   : > { %v674_v31 = vld.sshfl [vmem:[#allocation2 + $0x10] sm:$0xff pattern:$0x76325410]  ;;  %315 = vmatpush1.bf16.msra.mxu0 %v270_v30 }
  0xc1   : > { %v675_v32 = vld.sshfl [vmem:[#allocation2 + $0x18] sm:$0xff pattern:$0x76325410] }
  0xc2   : > { %v676_v33 = vld.sshfl [vmem:[#allocation2 + $0x20] sm:$0xff pattern:$0x76325410]  ;;  %v289_v34 = vcombine.high %v674_v31, %v675_v32  ;;  %v288_v35 = vcombine.low %v674_v31, %v675_v32 }
  0xc3   : > { %v298_v36 = vcombine.high %v676_v33, %v676_v33  ;;  %v309_v37 = vsel %vm307_vm11, %v676_v33, 0 }
  0xc4   : > { %316 = vmatprep.subr.bf16.mxu0 %v289_v34 }
  0xc5   : > { %317 = vmatpush1.bf16.msra.mxu0 %v288_v35 }
  0xc6   : > { %592 = vmatprep.subr.msk.bf16.mxu0 %vm307_vm11, %v298_v36  ;;  %vm425_vm11 = vcmask 913168  }
  0xc9   : > { %319 = vmatpush1.bf16.msra.mxu0 %v309_v37 }
  0xcc   : > { %593 = vmatmul.mubr.msk.bf16.vlgmr.msra.gmra.mrb[0].mxu0 %vm303_vm12, %v243_v38  ;;  %vm430_vm12 = vcmask 917268  }
 0x19f   : > { %v348_v39 = vpop.f32.mrb[0].mxu0 }
 0x1a0   : > { %v358_v40 = vrot.slane %v348_v39, 4  ;;  %362 = vrot.lane.b32.xlu0 %v348_v39, %s778_s3  ;;  %v350_v41 = vpop.f32.mrb[1].mxu0  ;;  %356 = vst.msk [vmem:[%s956_s17] sm:$0xf] %vm355_vm13, %v348_v39  ;;  %vm449_vm13 = vcmask 93184  }
 0x1a1   : > { %v352_v42 = vpop.f32.mrb[2].mxu0  ;;  %v438_v44 = vrot.slane %v350_v41, 4 }
 0x1a2   : > { %367 = vrot.lane.b32.xlu1 %v358_v40, %s778_s3  ;;  %v353_v43 = vpop.f32.mrb[3].mxu0  ;;  %361 = vst.msk [vmem:[%s956_s17] sm:$0xf0] %vm360_vm14, %v358_v40  ;;  %s792_s3 = smov 106   ;;  %vm456_vm14 = vcmask 97284  }
 0x1a4   : > { %372 = vrot.lane.b32.xlu0 %v348_v39, %s785_s19 }
 0x1a6   : > { %377 = vrot.lane.b32.xlu1 %v358_v40, %s785_s19 }
 0x1a8   : > { %382 = vrot.lane.b32.xlu0 %v348_v39, %s786_s23 }
 0x1aa   : > { %387 = vrot.lane.b32.xlu1 %v358_v40, %s786_s23 }
 0x1ac   : > { %392 = vrot.lane.b32.xlu0 %v348_v39, %s787_s24 }
 0x1ae   : > { %397 = vrot.lane.b32.xlu1 %v358_v40, %s787_s24 }
 0x1b0   : > { %402 = vrot.lane.b32.xlu0 %v348_v39, %s788_s26 }
 0x1b2   : > { %407 = vrot.lane.b32.xlu1 %v358_v40, %s788_s26 }
 0x1b4   : > { %412 = vrot.lane.b32.xlu0 %v348_v39, %s789_s27 }
 0x1b6   : > { %417 = vrot.lane.b32.xlu1 %v358_v40, %s789_s27 }
 0x1b8   : > { %422 = vrot.lane.b32.xlu0 %v348_v39, %s790_s29 }
 0x1ba   : > { %427 = vrot.lane.b32.xlu1 %v358_v40, %s790_s29 }
 0x1bc   : > { %444 = vrot.lane.b32.xlu0 %v350_v41, %s781_s4 }
 0x1be   : > { %451 = vrot.lane.b32.xlu1 %v438_v44, %s781_s4  ;;  %s513_s4 = sshll.u32 %s956_s17, 4  ;;  %s999_s4 = int_to_ptr.vmem [resolvable:$true] %s513_s4 }
 0x1bf   : > { %s707_s16 = scalar_lea.vmem %s999_s4, 256 }
 0x1c0   : > { %458 = vrot.lane.b32.xlu0 %v350_v41, %s791_s28  ;;  %p708_p6 = scmp.ne.s32.totalorder %s999_s4, %s707_s16 }
 0x1c2   : > { %463 = vrot.lane.b32.xlu1 %v438_v44, %s791_s28  ;;  %p709_p12 = pnand %p708_p6, %p1055_p11 }
 0x1c4   : > { %468 = vrot.lane.b32.xlu0 %v350_v41, %s792_s3  ;;  %p710_p13 = pneg %p709_p12 }
 0x1c6   : > { %473 = vrot.lane.b32.xlu1 %v438_v44, %s792_s3 }
 0x1c8   : > { %433 = vrot.lane.b32.xlu0 %v350_v41, %s777_s30 }
 0x1ca   : > { %439 = vrot.lane.b32.xlu1 %v438_v44, %s777_s30  ;;  %s600_s30 = sshll.u32 %s832_s13, 8  ;;  %s795_s13 = smov [#allocation6]  }
 0x1cb   : > { %s997_s8 = scalar_lea.hbm %s1044_s2, %s600_s30  ;;  %s711_s19 = sshll.u32 %s795_s13, 4  ;;  %s712_s19 = int_to_ptr.vmem [resolvable:$false] %s711_s19 }
 0x1cc   : > { %478 = vrot.lane.b32.xlu0 %v350_v41, %s793_s20  ;;  %s713_s23 = scalar_lea.vmem %s712_s19, 512  ;;  %p714_p7 = scmp.lt.s32.totalorder %s999_s4, %s712_s19 }
 0x1cd   : > { %p715_p10 = scmp.lt.s32.totalorder %s713_s23, %s707_s16 }
 0x1ce   : > { %483 = vrot.lane.b32.xlu1 %v438_v44, %s793_s20 }
 0x1cf   : > { %p716_p2 = por %p715_p10, %p714_p7 }
 0x1d0   : > { %488 = vrot.lane.b32.xlu0 %v350_v41, %s794_s5 }
 0x1d1   : > { %p717_p4 = pnand %p716_p2, %p710_p13 }
 0x1d2   : > { %493 = vrot.lane.b32.xlu1 %v438_v44, %s794_s5 }
 0x212   : > { %v363_v45 = vpop.permute.xlu0 %362 }
 0x213   : > { %366 = vst.msk [vmem:[%s956_s17] sm:$0xf] %vm365_vm15, %v363_v45  ;;  %vm461_vm15 = vcmask 207968  }
 0x214   : > { %v368_v46 = vpop.permute.xlu1 %367 }
 0x215   : > { %371 = vst.msk [vmem:[%s956_s17] sm:$0xf0] %vm370_vm0, %v368_v46  ;;  %vm466_vm0 = vcmask 212068  }
 0x216   : > { %v373_v47 = vpop.permute.xlu0 %372 }
 0x217   : > { %376 = vst.msk [vmem:[%s956_s17] sm:$0xf] %vm375_vm1, %v373_v47  ;;  %vm471_vm1 = vcmask 322768  }
 0x218   : > { %v378_v48 = vpop.permute.xlu1 %377 }
 0x219   : > { %381 = vst.msk [vmem:[%s956_s17] sm:$0xf0] %vm380_vm2, %v378_v48  ;;  %vm476_vm2 = vcmask 326868  }
 0x21a   : > { %v383_v49 = vpop.permute.xlu0 %382 }
 0x21b   : > { %386 = vst.msk [vmem:[%s956_s17] sm:$0xf] %vm385_vm3, %v383_v49  ;;  %vm436_vm3 = vcmask 1027968  }
 0x21c   : > { %v388_v50 = vpop.permute.xlu1 %387 }
 0x21d   : > { %391 = vst.msk [vmem:[%s956_s17] sm:$0xf0] %vm390_vm4, %v388_v50  ;;  %vm447_vm4 = vcmask 1044464  }
 0x21e   : > { %v393_v51 = vpop.permute.xlu0 %392 }
 0x21f   : > { %396 = vst.msk [vmem:[%s956_s17] sm:$0xf] %vm395_vm5, %v393_v51  ;;  %vm442_vm5 = vcmask 1032068  }
 0x220   : > { %v398_v52 = vpop.permute.xlu1 %397 }
 0x221   : > { %401 = vst.msk [vmem:[%s956_s17] sm:$0xf0] %vm400_vm6, %v398_v52  ;;  %vm454_vm6 = vcmask 1048564  }
 0x222   : > { %v403_v53 = vpop.permute.xlu0 %402 }
 0x223   : > { %406 = vst.msk [vmem:[%s956_s17] sm:$0xf] %vm405_vm7, %v403_v53  ;;  %vm481_vm7 = vcmask 437568  }
 0x224   : > { %v408_v54 = vpop.permute.xlu1 %407 }
 0x225   : > { %411 = vst.msk [vmem:[%s956_s17] sm:$0xf0] %vm410_vm8, %v408_v54  ;;  %vm486_vm8 = vcmask 441668  }
 0x226   : > { %v413_v55 = vpop.permute.xlu0 %412 }
 0x227   : > { %416 = vst.msk [vmem:[%s956_s17] sm:$0xf] %vm415_vm9, %v413_v55  ;;  %vm491_vm9 = vcmask 552368  }
 0x228   : > { %v418_v56 = vpop.permute.xlu1 %417 }
 0x229   : > { %421 = vst.msk [vmem:[%s956_s17] sm:$0xf0] %vm420_vm10, %v418_v56  ;;  %vm496_vm10 = vcmask 556468  }
 0x22a   : > { %v423_v57 = vpop.permute.xlu0 %422 }
 0x22b   : > { %426 = vst.msk [vmem:[%s956_s17] sm:$0xf] %vm425_vm11, %v423_v57 }
 0x22c   : > { %v428_v58 = vpop.permute.xlu1 %427 }
 0x22d   : > { %431 = vst.msk [vmem:[%s956_s17] sm:$0xf0] %vm430_vm12, %v428_v58 }
 0x22e   : > { %v445_v59 = vpop.permute.xlu0 %444 }
 0x22f   : > { %450 = vst.msk [vmem:[%s956_s17 + $0x8] sm:$0xf] %vm449_vm13, %v445_v59 }
 0x230   : > { %v452_v60 = vpop.permute.xlu1 %451 }
 0x231   : > { %457 = vst.msk [vmem:[%s956_s17 + $0x8] sm:$0xf0] %vm456_vm14, %v452_v60 }
 0x232   : > { %v459_v61 = vpop.permute.xlu0 %458 }
 0x233   : > { %462 = vst.msk [vmem:[%s956_s17 + $0x8] sm:$0xf] %vm461_vm15, %v459_v61 }
 0x234   : > { %v464_v62 = vpop.permute.xlu1 %463 }
 0x235   : > { %467 = vst.msk [vmem:[%s956_s17 + $0x8] sm:$0xf0] %vm466_vm0, %v464_v62 }
 0x236   : > { %v469_v63 = vpop.permute.xlu0 %468 }
 0x237   : > { %472 = vst.msk [vmem:[%s956_s17 + $0x8] sm:$0xf] %vm471_vm1, %v469_v63 }
 0x238   : > { %v474_v0 = vpop.permute.xlu1 %473 }
 0x239   : > { %477 = vst.msk [vmem:[%s956_s17 + $0x8] sm:$0xf0] %vm476_vm2, %v474_v0 }
 0x23a   : > { %v434_v1 = vpop.permute.xlu0 %433 }
 0x23b   : > { %437 = vst.msk [vmem:[%s956_s17] sm:$0xf] %vm436_vm3, %v434_v1 }
 0x23c   : > { %448 = vst.msk [vmem:[%s956_s17] sm:$0xf] %vm447_vm4, %v445_v59  ;;  %v440_v2 = vpop.permute.xlu1 %439 }
 0x23d   : > { %443 = vst.msk [vmem:[%s956_s17] sm:$0xf0] %vm442_vm5, %v440_v2 }
 0x23e   : > { %455 = vst.msk [vmem:[%s956_s17] sm:$0xf0] %vm454_vm6, %v452_v60  ;;  %v479_v3 = vpop.permute.xlu0 %478 }
 0x23f   : > { %482 = vst.msk [vmem:[%s956_s17 + $0x8] sm:$0xf] %vm481_vm7, %v479_v3 }
 0x240   : > { %v484_v4 = vpop.permute.xlu1 %483 }
 0x241   : > { %487 = vst.msk [vmem:[%s956_s17 + $0x8] sm:$0xf0] %vm486_vm8, %v484_v4 }
 0x242   : > { %v489_v5 = vpop.permute.xlu0 %488 }
 0x243   : > { %492 = vst.msk [vmem:[%s956_s17 + $0x8] sm:$0xf] %vm491_vm9, %v489_v5 }
 0x244   : > { %v494_v6 = vpop.permute.xlu1 %493 }
 0x245   : > { %497 = vst.msk [vmem:[%s956_s17 + $0x8] sm:$0xf0] %vm496_vm10, %v494_v6 }
 0x246   : > { %720 = shalt.err (!%p717_p4)
}
 0x247   : > { %s721_s25 = scalar_lea.hbm %s997_s8, 256  ;;  %s725_s26 = scalar_lea.hbm %s1044_s2, 512 }
 0x248   : > { %p722_p5 = scmp.ne.s32.totalorder %s997_s8, %s721_s25  ;;  %p726_p0 = scmp.lt.u32.totalorder %s997_s8, %s1044_s2 }
 0x249   : > { %p727_p1 = scmp.lt.u32.totalorder %s725_s26, %s721_s25  ;;  %p729_p6 = scmp.lt.u32.totalorder %s721_s25, %s997_s8 }
 0x24a   : > { %p723_p8 = pnand %p722_p5, %p1055_p11 }
 0x24b   : > { %p728_p3 = por %p727_p1, %p726_p0 }
 0x24c   : > { %p724_p9 = pneg %p723_p8 }
 0x24d   : > { %p730_p12 = por %p729_p6, %p728_p3 }
 0x24f   : > { %p731_p13 = pnand %p730_p12, %p724_p9 }
 0x251   : > { %734 = shalt.err (!%p731_p13)
}
 0x252   : > { %603 = dma.vmem_to_hbm [thread:$0]  (%p1055_p11), %s999_s4, 256, %s997_s8, %s499_s14  }
 0x253 PF: > { %s525_s28 = sand.u32 1, %s761_s9   ;;  %p1056_p7 = scmp.ne.s32.totalorder %s1049_s22, 0 }
 0x254   : > { %p1057_p10 = scmp.ge.s32.totalorder %s773_s12, 2  ;;  %s526_s3 = scalar_lea.sflag [#allocation5], %s525_s28 }
 0x256   : > { %p610_p2 = pnand %p1057_p10, %p1056_p7 }
 0x258   : > { %756 = dma.done.wait (!%p610_p2), %s526_s3, 256  }
 0x259   : > { %758 = vsyncadd (!%p610_p2), %s526_s3, 4294967040  ;;  %p15_p4 = scmp.ge.s32.totalorder %s836_s15, 4   ;;  %s1058_s9 = smov %s765_s10 }
 0x25a   : > { %s1059_s10 = smov %s769_s11  ;;  %s1060_s11 = smov %s848_s18 }
 0x25b   : > { %s1061_s12 = smov %s836_s15  ;;  %17 = sbr.rel (!%p15_p4) target bundleno = 5 (0x5), region = 82 }
 0x262   :  { %531 = vsyncpa [#allocation4], 1 }
 0x263   :  { %533 = vsyncpa [#allocation4 + $0x1], 1 }
 0x264   :  { %534 = vsyncpa [#allocation5], 1 }
 0x265   :  { %536 = vsyncpa [#allocation5 + $0x1], 1 }

</bundles_post_ra>
